<compile_context>
chip_gen: v5e
topology: v5e:2x2
jax: 0.10.0
libtpu: 0.0.40
codegen_flags: <defaults>
</compile_context>

<pallas_src>
import functools

import jax
import jax.numpy as jnp
from jax.experimental import pallas as pl
from jax.experimental.pallas import tpu as pltpu


_VMEM_LIMIT = 48 * 1024 * 1024      # <= v7x 64 MiB physical; generous on v5e/v6e
_TOKEN_TILE = 512                   # lane-dense token tile for matmul / MLP kernels
_HIDDEN_CHUNK = 512                 # 4C chunk width inside the LN/MLP kernel
_LN_EPS = 1e-6
_ACT_DTYPE = jnp.bfloat16           # carried activation / MXU operand dtype


def _largest_divisor_tile(n, target, quantum):
    """Largest divisor of n that is <= target and a multiple of `quantum`.
    Falls back to n itself (full extent is always a legal block dim)."""
    if n <= target:
        return n
    d = (min(target, n) // quantum) * quantum
    while d >= quantum:
        if n % d == 0:
            return d
        d -= quantum
    return n


# --------------------------------------------------------------- kernels ----

def _matmul_kernel(x_ref, w_ref, o_ref):
    o_ref[...] = jnp.dot(x_ref[...], w_ref[...],
                         preferred_element_type=jnp.float32).astype(o_ref.dtype)


def _dwconv7_kernel(x_ref, k_ref, b_ref, o_ref, *, H, W):
    # x_ref: (1, H+6, W+6, cg) zero-padded bf16; k_ref: (7, 7, cg) f32; b_ref: (1, cg)
    cg = o_ref.shape[-1]
    k = k_ref[...].astype(jnp.float32)
    acc = jnp.zeros((H, W, cg), jnp.float32)
    # dw shifts the sublane axis of the (W+6, cg) tile (unaligned -> retile copy),
    # so hoist it to the OUTER loop: 7 retiled slabs total instead of 49, and the
    # dh shifts become cheap above-tile slices of each slab.
    for dw in range(7):
        slab = x_ref[0, :, dw:dw + W, :].astype(jnp.float32)      # (H+6, W, cg)
        for dh in range(7):
            acc = acc + slab[dh:dh + H] * k[dh, dw, :]
    o_ref[0] = (acc + b_ref[...].astype(jnp.float32)).astype(o_ref.dtype)


def _ln_mlp_kernel(x_ref, lnw_ref, lnb_ref, w1_ref, b1_ref, w2_ref, b2_ref,
                   g_ref, o_ref, psum_ref, *, eps, hidden_chunk):
    t = pl.program_id(1)
    x = x_ref[0].astype(jnp.float32)                               # (tm, C)
    mean = jnp.mean(x, axis=-1, keepdims=True)
    var = jnp.mean(jnp.square(x - mean), axis=-1, keepdims=True)
    xn = (x - mean) * jax.lax.rsqrt(var + eps)
    xn = xn * lnw_ref[...] + lnb_ref[...]
    xn_b = xn.astype(w1_ref.dtype)                                 # bf16 for the MXU
    h4 = w1_ref.shape[1]
    acc = jnp.zeros((x.shape[0], w2_ref.shape[1]), jnp.float32)
    # Chunk the hidden (4C) dim so the GELU intermediate stays near vreg size.
    for lo in range(0, h4, hidden_chunk):
        hi = lo + hidden_chunk
        h = jnp.dot(xn_b, w1_ref[:, lo:hi],
                    preferred_element_type=jnp.float32) + b1_ref[:, lo:hi]
        # TODO(synk): PyTorch nn.GELU() is erf-exact; tanh-approx GELU used here
        # (EUP friendly), deviation ~1e-3 of the activation scale.
        h = jax.nn.gelu(h, approximate=True)
        acc = acc + jnp.dot(h.astype(w2_ref.dtype), w2_ref[lo:hi, :],
                            preferred_element_type=jnp.float32)
    y = (acc + b2_ref[...]) * g_ref[...]
    o_ref[0] = y.astype(o_ref.dtype)
    # Fused global-average-pool partial sums (saves a full HBM re-read of y).
    @pl.when(t == 0)
    def _():
        psum_ref[...] = jnp.zeros_like(psum_ref)
    psum_ref[...] += jnp.sum(y, axis=0, keepdims=True)[None]


def _scale_residual_kernel(y_ref, s_ref, r_ref, o_ref):
    # out = shortcut + (drop_path_scale[b] * se_gate[b, c]) * y    -- fully fused
    o_ref[...] = (r_ref[...].astype(jnp.float32)
                  + s_ref[...] * y_ref[...].astype(jnp.float32)).astype(o_ref.dtype)


# --------------------------------------------------------------- wrappers ---

def matmul_tokens(x, w, out_dtype=_ACT_DTYPE):
    """(T, K) @ (K, N) on the MXU (bf16 in / f32 acc), tiled over token blocks."""
    t, k = x.shape
    _, n = w.shape
    tm = _largest_divisor_tile(t, _TOKEN_TILE, 16)
    return pl.pallas_call(
        _matmul_kernel,
        out_shape=jax.ShapeDtypeStruct((t, n), out_dtype),
        grid=(t // tm,),
        in_specs=[pl.BlockSpec((tm, k), lambda i: (i, 0)),
                  pl.BlockSpec((k, n), lambda i: (0, 0))],
        out_specs=pl.BlockSpec((tm, n), lambda i: (i, 0)),
        compiler_params=pltpu.CompilerParams(
            dimension_semantics=("parallel",),
            vmem_limit_bytes=_VMEM_LIMIT),
    )(x, w)


def dwconv7x7(x, k, b):
    """7x7 depthwise conv (padding=3), NHWC, gridded (batch, channel-groups)."""
    B, H, W, C = x.shape
    # TODO(synk): the zero halo is still a padded HBM copy (bf16); an in-kernel
    # halo DMA would remove this extra activation round trip.
    xp = jnp.pad(x, ((0, 0), (3, 3), (3, 3), (0, 0)))
    Hp, Wp = H + 6, W + 6
    budget = 2 * 1024 * 1024
    per_c = Hp * Wp * x.dtype.itemsize
    if C <= 128 or C * per_c <= budget:
        cg = C
    else:
        cg = _largest_divisor_tile(C, max(128, budget // per_c), 128)
    return pl.pallas_call(
        functools.partial(_dwconv7_kernel, H=H, W=W),
        out_shape=jax.ShapeDtypeStruct((B, H, W, C), x.dtype),
        grid=(B, C // cg),
        in_specs=[pl.BlockSpec((1, Hp, Wp, cg), lambda i, j: (i, 0, 0, j)),
                  pl.BlockSpec((7, 7, cg), lambda i, j: (0, 0, j)),
                  pl.BlockSpec((1, cg), lambda i, j: (0, j))],
        out_specs=pl.BlockSpec((1, H, W, cg), lambda i, j: (i, 0, 0, j)),
        compiler_params=pltpu.CompilerParams(
            dimension_semantics=("parallel", "parallel"),
            vmem_limit_bytes=_VMEM_LIMIT),
    )(xp, k, b)


def ln_mlp_pool(x, blk, B, H, W):
    """Fused LayerNorm + pwconv1 + GELU + pwconv2 + gamma, gridded (batch, hw
    tiles); also emits per-batch pooled channel sums (fused global avg pool)."""
    C = x.shape[-1]
    HW = H * W
    x3 = x.reshape(B, HW, C)
    h4 = blk["w1"].shape[1]
    tm = _largest_divisor_tile(HW, _TOKEN_TILE, 16)
    hc = h4 if h4 <= _HIDDEN_CHUNK else _largest_divisor_tile(h4, _HIDDEN_CHUNK, 128)
    n_t = HW // tm
    const2 = lambda bi, ti: (0, 0)
    # TODO(synk): on v7x the resident weight BlockSpecs could be single-buffered
    # (pipeline_mode=pl.Buffered(1)) to free VMEM; kept default here.
    y, psum = pl.pallas_call(
        functools.partial(_ln_mlp_kernel, eps=_LN_EPS, hidden_chunk=hc),
        out_shape=(jax.ShapeDtypeStruct((B, HW, C), x.dtype),
                   jax.ShapeDtypeStruct((B, 1, C), jnp.float32)),
        grid=(B, n_t),
        in_specs=[pl.BlockSpec((1, tm, C), lambda bi, ti: (bi, ti, 0)),
                  pl.BlockSpec((1, C), const2),    # LayerNorm weight
                  pl.BlockSpec((1, C), const2),    # LayerNorm bias
                  pl.BlockSpec((C, h4), const2),   # pwconv1 weight (bf16)
                  pl.BlockSpec((1, h4), const2),   # pwconv1 bias
                  pl.BlockSpec((h4, C), const2),   # pwconv2 weight (bf16)
                  pl.BlockSpec((1, C), const2),    # pwconv2 bias
                  pl.BlockSpec((1, C), const2)],   # gamma (layer scale)
        out_specs=(pl.BlockSpec((1, tm, C), lambda bi, ti: (bi, ti, 0)),
                   pl.BlockSpec((1, 1, C), lambda bi, ti: (bi, 0, 0))),
        compiler_params=pltpu.CompilerParams(
            dimension_semantics=("parallel", "arbitrary"),
            vmem_limit_bytes=_VMEM_LIMIT),
    )(x3, blk["ln_w"], blk["ln_b"], blk["w1"], blk["b1"],
      blk["w2"], blk["b2"], blk["gamma"])
    pooled = psum[:, 0, :] / float(HW)
    return y.reshape(B, H, W, C), pooled


def scale_residual_add(y, scale_bc, shortcut):
    """out = shortcut + scale[b, c] * y.  W is folded into the last dim so the
    stored last dimension is W*C (lane-dense even when C < 128)."""
    B, H, W, C = y.shape
    wc = W * C
    row_budget = max(16, (2 * 1024 * 1024) // (wc * y.dtype.itemsize))
    th = _largest_divisor_tile(H, row_budget, 16)
    # scale[b, c] tiled along W so it matches the folded (w, c) ordering.
    scale_f = jnp.tile(scale_bc.astype(jnp.float32), (1, W)).reshape(B, 1, wc)
    out = pl.pallas_call(
        _scale_residual_kernel,
        out_shape=jax.ShapeDtypeStruct((B, H, wc), y.dtype),
        grid=(B, H // th),
        in_specs=[pl.BlockSpec((1, th, wc), lambda bi, hi: (bi, hi, 0)),
                  pl.BlockSpec((1, 1, wc), lambda bi, hi: (bi, 0, 0)),
                  pl.BlockSpec((1, th, wc), lambda bi, hi: (bi, hi, 0))],
        out_specs=pl.BlockSpec((1, th, wc), lambda bi, hi: (bi, hi, 0)),
        compiler_params=pltpu.CompilerParams(
            dimension_semantics=("parallel", "parallel"),
            vmem_limit_bytes=_VMEM_LIMIT),
    )(y.reshape(B, H, wc), scale_f, shortcut.reshape(B, H, wc))
    return out.reshape(B, H, W, C)


# ------------------------------------------------------- module forward -----

def se_gate(pooled, cat_feature, w1, w2):
    """SE-cat bottleneck (tiny (B, K) matmuls -> plain jnp, per perf review)."""
    hi = jax.lax.Precision.HIGHEST
    z = jnp.concatenate([pooled, cat_feature.astype(pooled.dtype)], axis=1)
    h = jnp.maximum(jnp.dot(z, w1, precision=hi), 0.0)
    return jax.nn.sigmoid(jnp.dot(h, w2, precision=hi))


def drop_path_scale(key, batch, drop_prob):
    """Per-sample stochastic-depth scale floor(keep + U[0,1)) / keep (float32)."""
    keep = 1.0 - drop_prob
    u = jax.random.uniform(key, (batch,), dtype=jnp.float32)
    return jnp.floor(keep + u) / keep


def pixel_shuffle_nchw(x, r):
    # TODO(synk): PixelShuffle is a pure reshape/transpose (layout op) left to XLA.
    B, C, H, W = x.shape
    x = x.reshape(B, C // (r * r), r, r, H, W)
    x = jnp.transpose(x, (0, 1, 4, 2, 5, 3))
    return x.reshape(B, C // (r * r), H * r, W * r)


def convnext_secat_block(blk, x, cat_feature, drop_scale):
    """One ConvNeXt Block with SE-cat gating (channels-last, bf16 carried)."""
    B, H, W, C = x.shape
    shortcut = x
    y = dwconv7x7(x, blk["dw_w"], blk["dw_b"])
    y, pooled = ln_mlp_pool(y, blk, B, H, W)
    se = se_gate(pooled, cat_feature, blk["se_w1"], blk["se_w2"])      # (B, C)
    # Fold the per-sample DropPath scale into the per-(b, c) SE gate so the
    # stochastic-depth multiply rides the residual-add kernel for free.
    scale = drop_scale[:, None] * se
    return scale_residual_add(y, scale, shortcut)


def decoder_block_forward(params, x_nchw, cat_feature, *, training=False, key=None):
    x = jnp.transpose(x_nchw, (0, 2, 3, 1)).astype(_ACT_DTYPE)       # NCHW -> NHWC
    B, H, W, _ = x.shape
    if params["down_w"] is not None:                                  # 1x1 "down" conv
        cout = params["down_w"].shape[1]
        x = matmul_tokens(x.reshape(B * H * W, -1),
                          params["down_w"]).reshape(B, H, W, cout)
    for blk in params["blocks"]:
        dp = blk["drop_prob"]
        if training and dp > 0.0:
            if key is None:
                raise ValueError("drop_path > 0 in training mode requires a PRNG key")
            key, sub = jax.random.split(key)
            dscale = drop_path_scale(sub, B, dp)
        else:
            dscale = jnp.ones((B,), jnp.float32)
        x = convnext_secat_block(blk, x, cat_feature, dscale)
    x = jnp.transpose(x, (0, 3, 1, 2)).astype(jnp.float32)
    return pixel_shuffle_nchw(x, 2)


class DecoderBlockPallas:
    """JAX/Pallas mirror of the PyTorch DecoderBlock forward pass."""

    def __init__(self, params):
        self.params = params
        self.training = True

    def __call__(self, x, cat_feature, key=None):
        return decoder_block_forward(self.params, x, cat_feature,
                                     training=self.training, key=key)


# ------------------------------------------------------------- params -------

def _init_block_params(key, dim, cat_planes, drop_prob):
    ks = jax.random.split(key, 11)
    n = lambda k, shape: 0.1 * jax.random.normal(k, shape, jnp.float32)
    hidden = dim // 16                                    # SeCatLayer reduction = 16
    return dict(
        dw_w=n(ks[0], (7, 7, dim)),
        dw_b=n(ks[1], (1, dim)),
        ln_w=1.0 + n(ks[2], (1, dim)),
        ln_b=n(ks[3], (1, dim)),
        # MXU weights stored in bf16 (reference promotes them to f32 -> same values)
        w1=n(ks[4], (dim, 4 * dim)).astype(_ACT_DTYPE),
        b1=n(ks[5], (1, 4 * dim)),
        w2=n(ks[6], (4 * dim, dim)).astype(_ACT_DTYPE),
        b2=n(ks[7], (1, dim)),
        # PyTorch inits gamma to 1e-6*ones; random values here so the test
        # actually exercises the residual branch (forward math is identical).
        gamma=n(ks[8], (1, dim)),
        se_w1=n(ks[9], (dim + cat_planes, hidden)),       # SeCatLayer fc: bias=False
        se_w2=n(ks[10], (hidden, dim)),
        drop_prob=float(drop_prob),
    )


def init_decoder_block(key, inplanes, planes, color_fc_out, block_num, cur, depths):
    drop_path_rate = 0.0                                  # matches DecoderBlock.__init__
    ks = jax.random.split(key, block_num + 1)
    down_w = None
    if inplanes != planes:
        down_w = (0.1 * jax.random.normal(ks[0], (inplanes, planes),
                                          jnp.float32)).astype(_ACT_DTYPE)
    dp_rates = jnp.linspace(0.0, drop_path_rate, depths)
    blocks = [_init_block_params(ks[1 + j], planes, color_fc_out,
                                 float(dp_rates[cur + j]))
              for j in range(block_num)]
    return dict(down_w=down_w, blocks=blocks)


# --------------------------------------------------------- pure-JAX ref -----

def decoder_block_reference(params, x_nchw, cat_feature):
    hi = jax.lax.Precision.HIGHEST
    x = jnp.transpose(x_nchw, (0, 2, 3, 1))
    if params["down_w"] is not None:
        x = jnp.einsum("bhwc,cd->bhwd", x, params["down_w"], precision=hi)
    for blk in params["blocks"]:
        shortcut = x
        c = x.shape[-1]
        y = jax.lax.conv_general_dilated(
            x, blk["dw_w"].reshape(7, 7, 1, c),
            window_strides=(1, 1), padding=((3, 3), (3, 3)),
            dimension_numbers=("NHWC", "HWIO", "NHWC"),
            feature_group_count=c, precision=hi)
        y = y + blk["dw_b"].reshape(1, 1, 1, c)
        mean = jnp.mean(y, axis=-1, keepdims=True)
        var = jnp.mean(jnp.square(y - mean), axis=-1, keepdims=True)
        yn = (y - mean) * jax.lax.rsqrt(var + _LN_EPS)
        yn = yn * blk["ln_w"].reshape(1, 1, 1, c) + blk["ln_b"].reshape(1, 1, 1, c)
        h = jnp.einsum("bhwc,cd->bhwd", yn, blk["w1"],
                       precision=hi) + blk["b1"].reshape(1, 1, 1, -1)
        h = jax.nn.gelu(h, approximate=True)
        y2 = jnp.einsum("bhwd,dc->bhwc", h, blk["w2"],
                        precision=hi) + blk["b2"].reshape(1, 1, 1, c)
        y2 = y2 * blk["gamma"].reshape(1, 1, 1, c)
        pooled = jnp.mean(y2, axis=(1, 2))
        z = jnp.concatenate([pooled, cat_feature], axis=1)
        hh = jnp.maximum(jnp.dot(z, blk["se_w1"], precision=hi), 0.0)
        se = jax.nn.sigmoid(jnp.dot(hh, blk["se_w2"], precision=hi))
        x = shortcut + y2 * se[:, None, None, :]          # drop_path rate is 0.0 here
    return pixel_shuffle_nchw(jnp.transpose(x, (0, 3, 1, 2)), 2)


# ------------------------------------------------------------------ main ----

if __name__ == "__main__":
    root = jax.random.PRNGKey(0)
    k_params, k_x, k_cat = jax.random.split(root, 3)

    # Small shapes consistent with the module: PixelShuffle(2) needs planes % 4 == 0
    # and SeCatLayer(reduction=16) needs planes >= 16.
    B, inplanes, planes, color_fc_out, H, W = 2, 64, 32, 8, 8, 8
    block_num, cur, depths = 2, 0, 2

    params = init_decoder_block(k_params, inplanes, planes, color_fc_out,
                                block_num, cur, depths)
    x = jax.random.normal(k_x, (B, inplanes, H, W), jnp.float32)
    cat_feature = jax.random.normal(k_cat, (B, color_fc_out), jnp.float32)

    model = DecoderBlockPallas(params)
    model.training = True                   # DecoderBlock hardcodes drop_path_rate = 0.0
    out = jax.block_until_ready(model(x, cat_feature))
    assert out.shape == (B, planes // 4, 2 * H, 2 * W), out.shape

    ref = jax.block_until_ready(decoder_block_reference(params, x, cat_feature))
    max_err = float(jnp.max(jnp.abs(out - ref)))
    # bf16 carried activations / MXU operands vs. f32 HIGHEST reference.
    assert jnp.allclose(out, ref, atol=3e-2, rtol=2e-2), f"max |diff| = {max_err}"

    print("KERNEL_OK")
</pallas_src>

<mosaic_0001>
module attributes {stable_mosaic.version = 11 : i64} {
  func.func @_matmul_kernel(%arg0: i32, %arg1: memref<128x64xbf16, #tpu.memory_space<vmem>>, %arg2: memref<64x32xbf16, #tpu.memory_space<vmem>>, %arg3: memref<128x32xbf16, #tpu.memory_space<vmem>>) attributes {dimension_semantics = [#tpu.dimension_semantics<parallel>], iteration_bounds = array<i64: 1>, scalar_prefetch = 0 : i64, scratch_operands = 0 : i64, tpu.core_type = #tpu.core_type<tc>, window_params = [{transform_indices = @transform_0, window_bounds = array<i64: 128, 64>}, {pipeline_mode = #tpu.pipeline_mode<synchronous>, transform_indices = @transform_1, window_bounds = array<i64: 64, 32>}, {transform_indices = @transform_2, window_bounds = array<i64: 128, 32>}]} {
    %c0 = arith.constant 0 : index
    %c0_0 = arith.constant 0 : index
    %0 = vector.load %arg1[%c0, %c0_0] : memref<128x64xbf16, #tpu.memory_space<vmem>>, vector<128x64xbf16>
    %c0_1 = arith.constant 0 : index
    %c0_2 = arith.constant 0 : index
    %1 = vector.load %arg2[%c0_1, %c0_2] : memref<64x32xbf16, #tpu.memory_space<vmem>>, vector<64x32xbf16>
    %cst = arith.constant dense<0.000000e+00> : vector<128x32xf32>
    %2 = tpu.matmul %0, %1, %cst {dimension_numbers = #tpu.dot_dimension_numbers<[1], [0], [0], [1], [0, 0, 1, 1], [], []>} : vector<128x64xbf16>, vector<64x32xbf16>, vector<128x32xf32> -> vector<128x32xf32>
    %3 = arith.truncf %2 : vector<128x32xf32> to vector<128x32xbf16>
    %c0_3 = arith.constant 0 : index
    %c0_4 = arith.constant 0 : index
    %4 = vector.load %arg3[%c0_3, %c0_4] : memref<128x32xbf16, #tpu.memory_space<vmem>>, vector<128x32xbf16>
    tpu.vector_store %arg3[%c0_3, %c0_4], %3 {strides = array<i32>} : memref<128x32xbf16, #tpu.memory_space<vmem>>, vector<128x32xbf16>,
    return
  }
  func.func @transform_0(%arg0: i32) -> (i32, i32) {
    %c0_i32 = arith.constant 0 : i32
    %c0_i32_0 = arith.constant 0 : i32
    return %arg0, %c0_i32 : i32, i32
  }
  func.func @transform_1(%arg0: i32) -> (i32, i32) {
    %c0_i32 = arith.constant 0 : i32
    %c0_i32_0 = arith.constant 0 : i32
    %c0_i32_1 = arith.constant 0 : i32
    return %c0_i32, %c0_i32_0 : i32, i32
  }
  func.func @transform_2(%arg0: i32) -> (i32, i32) {
    %c0_i32 = arith.constant 0 : i32
    %c0_i32_0 = arith.constant 0 : i32
    return %arg0, %c0_i32 : i32, i32
  }
}

</mosaic_0001>

<bundles_post_ra>
// kernel: tpu_custom_call.1
= control target key start
LH: loop header
LB: loop body
LE: loop exit
PB: predicated region body
PF: predicated region fallthrough
CT: control target
= control target key end

     0   :  { %vm100_vm0 = vcmask 523264   ;;  %vm190_vm1 = vcmask 257024   ;;  %s414_s1 = inlined_call_operand.vmem [shape: bf16[64,32], index: 1, kind: input, shape index: {}]   ;;  %s415_s0 = inlined_call_operand.vmem [shape: bf16[128,64], index: 0, kind: input, shape index: {}]   ;;  %s416_s2 = inlined_call_operand.vmem [shape: bf16[128,32], index: 2, kind: output, shape index: {}]  }
   0x1   :  { %v278_v0 = vld [vmem:[%s414_s1 + $0x18] sm:$0xff]  ;;  %v277_v1 = vld [vmem:[%s414_s1 + $0x10] sm:$0xff]  ;;  %v276_v2 = vld [vmem:[%s414_s1 + $0x8] sm:$0xff] }
   0x2   :  { %129 = vmatpush.bf16.msra.mxu0 %v278_v0  ;;  %279 = vmatpush.bf16.msra.mxu1 %v278_v0  ;;  %v275_v3 = vld [vmem:[%s414_s1] sm:$0xff]  ;;  %v269_v5 = vld [vmem:[%s415_s0 + $0x10] sm:$0xff]  ;;  %v268_v8 = vld [vmem:[%s415_s0 + $0x8] sm:$0xff] }
   0x3   :  { %280 = vmatpush.bf16.msra.mxu2 %v278_v0  ;;  %281 = vmatpush.bf16.msra.mxu3 %v278_v0  ;;  %v267_v4 = vld [vmem:[%s415_s0] sm:$0xff]  ;;  %v273_v7 = vld [vmem:[%s415_s0 + $0x30] sm:$0xff]  ;;  %v270_v9 = vld [vmem:[%s415_s0 + $0x18] sm:$0xff] }
   0x4   :  { %v271_v6 = vld [vmem:[%s415_s0 + $0x20] sm:$0xff]  ;;  %v272_v10 = vld [vmem:[%s415_s0 + $0x28] sm:$0xff]  ;;  %v274_v11 = vld [vmem:[%s415_s0 + $0x38] sm:$0xff] }
   0x6   :  { %130 = vmatpush.bf16.msra.mxu0 %v277_v1  ;;  %282 = vmatpush.bf16.msra.mxu1 %v277_v1 }
   0x7   :  { %283 = vmatpush.bf16.msra.mxu2 %v277_v1  ;;  %284 = vmatpush.bf16.msra.mxu3 %v277_v1 }
   0xa   :  { %131 = vmatpush.bf16.msra.mxu0 %v276_v2  ;;  %285 = vmatpush.bf16.msra.mxu1 %v276_v2 }
   0xb   :  { %286 = vmatpush.bf16.msra.mxu2 %v276_v2  ;;  %287 = vmatpush.bf16.msra.mxu3 %v276_v2 }
   0xe   :  { %132 = vmatpush.bf16.msra.mxu0 %v275_v3  ;;  %288 = vmatpush.bf16.msra.mxu1 %v275_v3 }
   0xf   :  { %289 = vmatpush.bf16.msra.mxu2 %v275_v3  ;;  %290 = vmatpush.bf16.msra.mxu3 %v275_v3 }
  0x11   :  { %259 = vmatmul.msk.bf16.vlgmr.msra.gmra.mxu0 %vm100_vm0, %v267_v4  ;;  %261 = vmatmul.msk.bf16.vlgmr.msra.gmra.mxu1 %vm100_vm0, %v269_v5 }
  0x12   :  { %263 = vmatmul.msk.bf16.vlgmr.msra.gmra.mxu2 %vm100_vm0, %v271_v6  ;;  %265 = vmatmul.msk.bf16.vlgmr.msra.gmra.mxu3 %vm100_vm0, %v273_v7 }
  0x21   :  { %260 = vmatmul.msk.bf16.gmra.mxu0 %vm100_vm0, %v268_v8  ;;  %262 = vmatmul.msk.bf16.gmra.mxu1 %vm100_vm0, %v270_v9 }
  0x22   :  { %264 = vmatmul.msk.bf16.gmra.mxu2 %vm100_vm0, %v272_v10  ;;  %266 = vmatmul.msk.bf16.gmra.mxu3 %vm100_vm0, %v274_v11 }
  0x8e   :  { %v134_v12 = vpop.f32.mrf.mxu0  ;;  %v144_v13 = vpop.f32.mrf.mxu1 }
  0x8f   :  { %v174_v14 = vpack.c.bf16 %v134_v12, %v134_v12  ;;  %v178_v15 = vpack.c.bf16 %v144_v13, %v144_v13 }
  0x91   :  { %191 = vst.msk [vmem:[%s416_s2] sm:$0xf] %vm190_vm1, %v174_v14 }
  0x92   :  { %195 = vst.msk [vmem:[%s416_s2 + $0x10] sm:$0xf] %vm190_vm1, %v178_v15 }
  0x95   :  { %v154_v16 = vpop.f32.mrf.mxu2  ;;  %v164_v17 = vpop.f32.mrf.mxu3 }
  0x96   :  { %v182_v18 = vpack.c.bf16 %v154_v16, %v154_v16  ;;  %v186_v19 = vpack.c.bf16 %v164_v17, %v164_v17  ;;  %v136_v20 = vpop.f32.mrf.mxu0  ;;  %v146_v21 = vpop.f32.mrf.mxu1 }
  0x97   :  { %v175_v22 = vpack.c.bf16 %v136_v20, %v136_v20  ;;  %v179_v23 = vpack.c.bf16 %v146_v21, %v146_v21 }
  0x98   :  { %199 = vst.msk [vmem:[%s416_s2 + $0x20] sm:$0xf] %vm190_vm1, %v182_v18 }
  0x99   :  { %203 = vst.msk [vmem:[%s416_s2 + $0x30] sm:$0xf] %vm190_vm1, %v186_v19 }
  0x9a   :  { %192 = vst.msk [vmem:[%s416_s2 + $0x4] sm:$0xf] %vm190_vm1, %v175_v22 }
  0x9b   :  { %196 = vst.msk [vmem:[%s416_s2 + $0x14] sm:$0xf] %vm190_vm1, %v179_v23 }
  0x9d   :  { %v156_v24 = vpop.f32.mrf.mxu2  ;;  %v166_v25 = vpop.f32.mrf.mxu3 }
  0x9e   :  { %v183_v26 = vpack.c.bf16 %v156_v24, %v156_v24  ;;  %v187_v27 = vpack.c.bf16 %v166_v25, %v166_v25  ;;  %v139_v28 = vpop.f32.mrf.mxu0  ;;  %v149_v29 = vpop.f32.mrf.mxu1 }
  0x9f   :  { %v176_v30 = vpack.c.bf16 %v139_v28, %v139_v28  ;;  %v180_v31 = vpack.c.bf16 %v149_v29, %v149_v29 }
  0xa0   :  { %200 = vst.msk [vmem:[%s416_s2 + $0x24] sm:$0xf] %vm190_vm1, %v183_v26 }
  0xa1   :  { %204 = vst.msk [vmem:[%s416_s2 + $0x34] sm:$0xf] %vm190_vm1, %v187_v27 }
  0xa2   :  { %193 = vst.msk [vmem:[%s416_s2 + $0x8] sm:$0xf] %vm190_vm1, %v176_v30 }
  0xa3   :  { %197 = vst.msk [vmem:[%s416_s2 + $0x18] sm:$0xf] %vm190_vm1, %v180_v31 }
  0xa5   :  { %v159_v32 = vpop.f32.mrf.mxu2  ;;  %v169_v33 = vpop.f32.mrf.mxu3 }
  0xa6   :  { %v184_v34 = vpack.c.bf16 %v159_v32, %v159_v32  ;;  %v188_v35 = vpack.c.bf16 %v169_v33, %v169_v33  ;;  %v141_v36 = vpop.f32.mrf.mxu0  ;;  %v151_v37 = vpop.f32.mrf.mxu1 }
  0xa7   :  { %v177_v38 = vpack.c.bf16 %v141_v36, %v141_v36  ;;  %v181_v39 = vpack.c.bf16 %v151_v37, %v151_v37 }
  0xa8   :  { %201 = vst.msk [vmem:[%s416_s2 + $0x28] sm:$0xf] %vm190_vm1, %v184_v34 }
  0xa9   :  { %205 = vst.msk [vmem:[%s416_s2 + $0x38] sm:$0xf] %vm190_vm1, %v188_v35 }
  0xaa   :  { %194 = vst.msk [vmem:[%s416_s2 + $0xc] sm:$0xf] %vm190_vm1, %v177_v38 }
  0xab   :  { %198 = vst.msk [vmem:[%s416_s2 + $0x1c] sm:$0xf] %vm190_vm1, %v181_v39 }
  0xad   :  { %v161_v40 = vpop.f32.mrf.mxu2  ;;  %v171_v41 = vpop.f32.mrf.mxu3 }
  0xae   :  { %v185_v42 = vpack.c.bf16 %v161_v40, %v161_v40  ;;  %v189_v43 = vpack.c.bf16 %v171_v41, %v171_v41 }
  0xb0   :  { %202 = vst.msk [vmem:[%s416_s2 + $0x2c] sm:$0xf] %vm190_vm1, %v185_v42 }
  0xb1   :  { %206 = vst.msk [vmem:[%s416_s2 + $0x3c] sm:$0xf] %vm190_vm1, %v189_v43 }

</bundles_post_ra>
